<compile_context>
chip_gen: v5e
topology: v5e:2x2
jax: 0.10.0
libtpu: 0.0.40
codegen_flags: <defaults>
</compile_context>

<pallas_src>
import jax
import jax.numpy as jnp
from jax import lax
from jax.experimental import pallas as pl
from jax.experimental.pallas import tpu as pltpu


def _mlp_kernel(x_ref, w1_ref, b1_ref, w2_ref, b2_ref, w3_ref, b3_ref, o_ref):
    # x_ref: [B_TILE, in_features]  (natural HBM layout -> contiguous DMA reads)
    xb = x_ref[...].astype(jnp.bfloat16)        # bf16 inputs -> single-pass MXU matmuls

    # Layer 1: [hidden, B] = W1 . x^T  — contract the feature axis of both operands
    # (transposed-RHS matmul), so no wrapper-side transpose of x is needed.
    h1 = lax.dot_general(w1_ref[...], xb,
                         dimension_numbers=(((1,), (1,)), ((), ())),
                         preferred_element_type=jnp.float32)
    h1 = jnp.maximum(h1 + b1_ref[...], 0.0)     # bias + ReLU; Dropout(0.2) = identity (eval)

    # Layer 2: [hidden//2, B] = W2 @ h1   (standard MXU matmul, bf16 single pass, f32 acc)
    h2 = jnp.dot(w2_ref[...], h1.astype(jnp.bfloat16),
                 preferred_element_type=jnp.float32)
    h2 = jnp.maximum(h2 + b2_ref[...], 0.0)     # bias + ReLU

    # Layer 3 (hidden//2 -> 1): VPU broadcast-mul + XLU sublane reduce instead of an
    # M=1 MXU push; scalar bias read from SMEM.  Output stays lane-dense [1, B].
    out = jnp.sum(h2 * w3_ref[...], axis=0, keepdims=True) + b3_ref[0, 0]
    o_ref[...] = out.astype(o_ref.dtype)


def _resident(shape):
    # Constant index_map: block is DMA'd once and stays resident in VMEM across
    # every batch-tile grid step.
    # (pipeline_mode=pl.Buffered(1) would drop the pointless second buffer; skipped
    #  here to keep the lowering maximally portable — these blocks are a few KiB.)
    return pl.BlockSpec(shape, lambda i: (0, 0))


def upsell_predictor_forward(x, params, b_tile=16384):
    """x: [batch, input_size] float32. params: dict (see init_params). Returns [batch, 1]."""
    batch, in_features = x.shape
    hidden = params["w1"].shape[0]
    hidden2 = params["w2"].shape[0]

    # ---- batch tiling -----------------------------------------------------------
    b_tile = max(128, (int(b_tile) // 128) * 128)
    padded128 = pl.cdiv(batch, 128) * 128
    if padded128 >= 256:
        # Guarantee >= 2 grid steps so v7x's two TensorCores both get work via
        # dimension_semantics=("parallel",); harmless on single-TC v5e/v6e.
        b_tile_eff = min(b_tile, ((padded128 // 2) // 128) * 128)
    else:
        b_tile_eff = 128
    grid_steps = pl.cdiv(batch, b_tile_eff)
    padded = grid_steps * b_tile_eff

    # ---- input handling: read x from HBM exactly once ---------------------------
    # No transpose.  Only a single-tile batch gets padded (tiny copy); multi-tile
    # batches are passed unpadded and the final partial tile relies on Pallas'
    # ragged-last-block handling (undefined tail rows only feed output columns that
    # are sliced away below — each batch column is computed independently).
    if batch < b_tile_eff and padded != batch:
        x_in = jnp.pad(x, ((0, padded - batch), (0, 0)))
    else:
        x_in = x

    # bf16 weights for the two MXU layers (single-pass matmuls, f32 accumulation).
    w1 = params["w1"].astype(jnp.bfloat16)           # [hidden, in]
    w2 = params["w2"].astype(jnp.bfloat16)           # [hidden2, hidden]
    args = (x_in, w1, params["b1"], w2, params["b2"], params["w3"], params["b3"])

    in_specs = [
        pl.BlockSpec((b_tile_eff, in_features), lambda i: (i, 0)),   # streamed x tiles
        _resident((hidden, in_features)),                            # W1 (bf16)
        _resident((hidden, 1)),                                      # b1
        _resident((hidden2, hidden)),                                # W2 (bf16)
        _resident((hidden2, 1)),                                     # b2
        _resident((hidden2, 1)),                                     # w3 column
        pl.BlockSpec(memory_space=pltpu.MemorySpace.SMEM),           # b3 scalar (SMEM)
    ]
    out_specs = pl.BlockSpec((1, b_tile_eff), lambda i: (0, i))      # lane-dense output

    param_bytes = sum(int(p.size) * p.dtype.itemsize for p in args[1:])
    flops = 2 * padded * (in_features * hidden + hidden * hidden2 + hidden2)
    bytes_accessed = (batch * in_features * x.dtype.itemsize   # x read exactly once
                      + padded * 4 + param_bytes)

    out_t = pl.pallas_call(
        _mlp_kernel,
        out_shape=jax.ShapeDtypeStruct((1, padded), jnp.float32),
        grid=(grid_steps,),
        in_specs=in_specs,
        out_specs=out_specs,
        compiler_params=pltpu.CompilerParams(
            dimension_semantics=("parallel",),
            vmem_limit_bytes=48 * 1024 * 1024),   # large tiles fit on v5e/v6e/v7x
        cost_estimate=pl.CostEstimate(
            flops=flops, transcendentals=0, bytes_accessed=bytes_accessed),
    )(*args)

    return out_t[0, :batch].reshape(batch, 1)


def init_params(key, input_size=10, hidden_size=32):
    """Deterministic synthetic parameters matching nn.Linear init & shapes.

    w1: [hidden, in], w2: [hidden//2, hidden] (PyTorch nn.Linear.weight layout),
    w3: [hidden//2, 1] (column), biases as [out, 1].
    """
    dims = [input_size, hidden_size, hidden_size // 2, 1]
    params = {}
    for i in range(3):
        key, kw, kb = jax.random.split(key, 3)
        fan_in, fan_out = dims[i], dims[i + 1]
        bound = 1.0 / jnp.sqrt(fan_in)
        w = jax.random.uniform(kw, (fan_out, fan_in), jnp.float32, -bound, bound)
        b = jax.random.uniform(kb, (fan_out, 1), jnp.float32, -bound, bound)
        if i == 2:
            w = w.T        # store final-layer weight as a column [hidden//2, 1]
        params[f"w{i+1}"] = w
        params[f"b{i+1}"] = b
    return params


def reference_forward(x, params):
    h = jnp.maximum(x @ params["w1"].T + params["b1"].T, 0.0)   # Dropout eval = identity
    h = jnp.maximum(h @ params["w2"].T + params["b2"].T, 0.0)
    return h @ params["w3"] + params["b3"]                      # [batch, 1]


if __name__ == "__main__":
    key = jax.random.PRNGKey(0)
    key, kx, kp = jax.random.split(key, 3)

    batch, input_size, hidden_size = 8, 10, 32
    x = jax.random.normal(kx, (batch, input_size), jnp.float32)
    params = init_params(kp, input_size, hidden_size)

    out = jax.block_until_ready(upsell_predictor_forward(x, params))
    ref = reference_forward(x, params)

    assert out.shape == (batch, 1)
    # bf16 MXU inputs (f32 accumulation) -> compare against the f32 reference at ~1e-2.
    assert jnp.allclose(out, ref, atol=2e-2, rtol=2e-2), (out, ref)

    print("KERNEL_OK")
</pallas_src>

<mosaic_0001>
module attributes {stable_mosaic.version = 11 : i64} {
  func.func @_mlp_kernel(%arg0: i32, %arg1: memref<128x10xf32, #tpu.memory_space<vmem>>, %arg2: memref<32x10xbf16, #tpu.memory_space<vmem>>, %arg3: memref<32x1xf32, #tpu.memory_space<vmem>>, %arg4: memref<16x32xbf16, #tpu.memory_space<vmem>>, %arg5: memref<16x1xf32, #tpu.memory_space<vmem>>, %arg6: memref<16x1xf32, #tpu.memory_space<vmem>>, %arg7: memref<1x1xf32, #tpu.memory_space<smem>>, %arg8: memref<1x128xf32, #tpu.memory_space<vmem>>) attributes {dimension_semantics = [#tpu.dimension_semantics<parallel>], iteration_bounds = array<i64: 1>, scalar_prefetch = 0 : i64, scratch_operands = 0 : i64, tpu.core_type = #tpu.core_type<tc>, window_params = [{transform_indices = @transform_0, window_bounds = array<i64: 128, 10>}, {pipeline_mode = #tpu.pipeline_mode<synchronous>, transform_indices = @transform_1, window_bounds = array<i64: 32, 10>}, {pipeline_mode = #tpu.pipeline_mode<synchronous>, transform_indices = @transform_2, window_bounds = array<i64: 32, 1>}, {pipeline_mode = #tpu.pipeline_mode<synchronous>, transform_indices = @transform_3, window_bounds = array<i64: 16, 32>}, {pipeline_mode = #tpu.pipeline_mode<synchronous>, transform_indices = @transform_4, window_bounds = array<i64: 16, 1>}, {pipeline_mode = #tpu.pipeline_mode<synchronous>, transform_indices = @transform_5, window_bounds = array<i64: 16, 1>}, {transform_indices = @transform_6, window_bounds = array<i64: 1, 1>}, {transform_indices = @transform_7, window_bounds = array<i64: 1, 128>}]} {
    %c0 = arith.constant 0 : index
    %c0_0 = arith.constant 0 : index
    %0 = vector.load %arg1[%c0, %c0_0] : memref<128x10xf32, #tpu.memory_space<vmem>>, vector<128x10xf32>
    %1 = arith.truncf %0 : vector<128x10xf32> to vector<128x10xbf16>
    %c0_1 = arith.constant 0 : index
    %c0_2 = arith.constant 0 : index
    %2 = vector.load %arg2[%c0_1, %c0_2] : memref<32x10xbf16, #tpu.memory_space<vmem>>, vector<32x10xbf16>
    %cst = arith.constant dense<0.000000e+00> : vector<32x128xf32>
    %3 = tpu.matmul %2, %1, %cst {dimension_numbers = #tpu.dot_dimension_numbers<[1], [1], [0], [0], [0, 0, 1, 0], [], []>} : vector<32x10xbf16>, vector<128x10xbf16>, vector<32x128xf32> -> vector<32x128xf32>
    %c0_3 = arith.constant 0 : index
    %c0_4 = arith.constant 0 : index
    %4 = vector.load %arg3[%c0_3, %c0_4] : memref<32x1xf32, #tpu.memory_space<vmem>>, vector<32x1xf32>
    %5 = vector.broadcast %4 : vector<32x1xf32> to vector<32x128xf32>
    %6 = arith.addf %3, %5 : vector<32x128xf32>
    %cst_5 = arith.constant 0.000000e+00 : f32
    %7 = vector.broadcast %cst_5 : f32 to vector<32x128xf32>
    %8 = arith.maximumf %6, %7 : vector<32x128xf32>
    %c0_6 = arith.constant 0 : index
    %c0_7 = arith.constant 0 : index
    %9 = vector.load %arg4[%c0_6, %c0_7] : memref<16x32xbf16, #tpu.memory_space<vmem>>, vector<16x32xbf16>
    %10 = arith.truncf %8 : vector<32x128xf32> to vector<32x128xbf16>
    %cst_8 = arith.constant dense<0.000000e+00> : vector<16x128xf32>
    %11 = tpu.matmul %9, %10, %cst_8 {dimension_numbers = #tpu.dot_dimension_numbers<[1], [0], [0], [1], [0, 0, 1, 1], [], []>} : vector<16x32xbf16>, vector<32x128xbf16>, vector<16x128xf32> -> vector<16x128xf32>
    %c0_9 = arith.constant 0 : index
    %c0_10 = arith.constant 0 : index
    %12 = vector.load %arg5[%c0_9, %c0_10] : memref<16x1xf32, #tpu.memory_space<vmem>>, vector<16x1xf32>
    %13 = vector.broadcast %12 : vector<16x1xf32> to vector<16x128xf32>
    %14 = arith.addf %11, %13 : vector<16x128xf32>
    %cst_11 = arith.constant 0.000000e+00 : f32
    %15 = vector.broadcast %cst_11 : f32 to vector<16x128xf32>
    %16 = arith.maximumf %14, %15 : vector<16x128xf32>
    %c0_12 = arith.constant 0 : index
    %c0_13 = arith.constant 0 : index
    %17 = vector.load %arg6[%c0_12, %c0_13] : memref<16x1xf32, #tpu.memory_space<vmem>>, vector<16x1xf32>
    %18 = vector.broadcast %17 : vector<16x1xf32> to vector<16x128xf32>
    %19 = arith.mulf %16, %18 : vector<16x128xf32>
    %cst_14 = arith.constant dense<0.000000e+00> : vector<128xf32>
    %20 = vector.multi_reduction <add>, %19, %cst_14 [0] : vector<16x128xf32> to vector<128xf32>
    %21 = vector.shape_cast %20 : vector<128xf32> to vector<1x128xf32>
    %c0_15 = arith.constant 0 : index
    %c0_16 = arith.constant 0 : index
    %22 = memref.load %arg7[%c0_15, %c0_16] : memref<1x1xf32, #tpu.memory_space<smem>>
    %23 = vector.broadcast %22 : f32 to vector<1x128xf32>
    %24 = arith.addf %21, %23 : vector<1x128xf32>
    %c0_17 = arith.constant 0 : index
    %c0_18 = arith.constant 0 : index
    %25 = vector.load %arg8[%c0_17, %c0_18] : memref<1x128xf32, #tpu.memory_space<vmem>>, vector<1x128xf32>
    tpu.vector_store %arg8[%c0_17, %c0_18], %24 {strides = array<i32>} : memref<1x128xf32, #tpu.memory_space<vmem>>, vector<1x128xf32>,
    return
  }
  func.func @transform_0(%arg0: i32) -> (i32, i32) {
    %c0_i32 = arith.constant 0 : i32
    %c0_i32_0 = arith.constant 0 : i32
    return %arg0, %c0_i32 : i32, i32
  }
  func.func @transform_1(%arg0: i32) -> (i32, i32) {
    %c0_i32 = arith.constant 0 : i32
    %c0_i32_0 = arith.constant 0 : i32
    %c0_i32_1 = arith.constant 0 : i32
    return %c0_i32, %c0_i32_0 : i32, i32
  }
  func.func @transform_2(%arg0: i32) -> (i32, i32) {
    %c0_i32 = arith.constant 0 : i32
    %c0_i32_0 = arith.constant 0 : i32
    %c0_i32_1 = arith.constant 0 : i32
    return %c0_i32, %c0_i32_0 : i32, i32
  }
  func.func @transform_3(%arg0: i32) -> (i32, i32) {
    %c0_i32 = arith.constant 0 : i32
    %c0_i32_0 = arith.constant 0 : i32
    %c0_i32_1 = arith.constant 0 : i32
    return %c0_i32, %c0_i32_0 : i32, i32
  }
  func.func @transform_4(%arg0: i32) -> (i32, i32) {
    %c0_i32 = arith.constant 0 : i32
    %c0_i32_0 = arith.constant 0 : i32
    %c0_i32_1 = arith.constant 0 : i32
    return %c0_i32, %c0_i32_0 : i32, i32
  }
  func.func @transform_5(%arg0: i32) -> (i32, i32) {
    %c0_i32 = arith.constant 0 : i32
    %c0_i32_0 = arith.constant 0 : i32
    %c0_i32_1 = arith.constant 0 : i32
    return %c0_i32, %c0_i32_0 : i32, i32
  }
  func.func @transform_6(%arg0: i32) -> (i32, i32) {
    %c0_i32 = arith.constant 0 : i32
    %c0_i32_0 = arith.constant 0 : i32
    %c0_i32_1 = arith.constant 0 : i32
    return %c0_i32, %c0_i32_0 : i32, i32
  }
  func.func @transform_7(%arg0: i32) -> (i32, i32) {
    %c0_i32 = arith.constant 0 : i32
    %c0_i32_0 = arith.constant 0 : i32
    return %c0_i32, %arg0 : i32, i32
  }
}

</mosaic_0001>

<bundles_post_ra>
// kernel: tpu_custom_call.1
= control target key start
LH: loop header
LB: loop body
LE: loop exit
PB: predicated region body
PF: predicated region fallthrough
CT: control target
= control target key end

     0   :  { %vm91_vm0 = vcmask 80896   ;;  %s423_s0 = inlined_call_operand.vmem [shape: f32[128,10], index: 0, kind: input, shape index: {}]   ;;  %s424_s1 = inlined_call_operand.vmem [shape: bf16[32,10], index: 1, kind: input, shape index: {}]   ;;  %s425_s2 = inlined_call_operand.vmem [shape: f32[32,1], index: 2, kind: input, shape index: {}]   ;;  %s426_s3 = inlined_call_operand.vmem [shape: bf16[16,32], index: 3, kind: input, shape index: {}]   ;;  %s427_s4 = inlined_call_operand.vmem [shape: f32[16,1], index: 4, kind: input, shape index: {}]   ;;  %s428_s5 = inlined_call_operand.vmem [shape: f32[16,1], index: 5, kind: input, shape index: {}]   ;;  %s429_s6 = inlined_call_operand.<no memory space> [shape: f32[1,1], index: 6, kind: input, shape index: {}]   ;;  %s430_s7 = inlined_call_operand.hbm [shape: f32[1,128], index: 7, kind: output, shape index: {}]  }
   0x1   :  { %v43_v0 = vld [vmem:[%s423_s0 + $0x70] sm:$0xff]  ;;  %v44_v1 = vld [vmem:[%s423_s0 + $0x78] sm:$0xff]  ;;  %v41_v3 = vld [vmem:[%s423_s0 + $0x60] sm:$0xff] }
   0x2   :  { %v52_v2 = vpack.c.bf16 %v44_v1, %v43_v0  ;;  %v42_v4 = vld [vmem:[%s423_s0 + $0x68] sm:$0xff] }
   0x4   :  { %v120_v5 = vsel %vm91_vm0, %v52_v2, 0 }
   0x5   :  { %13 = vsyncpa [#allocation4], 0  ;;  %245 = vmatpush.bf16.xpose.msra.mxu2 %v120_v5  ;;  %122 = vmatpush.bf16.xpose.msra.mxu0 %v120_v5  ;;  %v51_v6 = vpack.c.bf16 %v42_v4, %v41_v3  ;;  %v39_v8 = vld [vmem:[%s423_s0 + $0x50] sm:$0xff]  ;;  %v40_v9 = vld [vmem:[%s423_s0 + $0x58] sm:$0xff]  ;;  %v284_v19 = vmov 0   ;;  %vm166_vm1 = vcmask 261120  }
   0x6   :  { %v50_v10 = vpack.c.bf16 %v40_v9, %v39_v8  ;;  %v37_v12 = vld [vmem:[%s423_s0 + $0x40] sm:$0xff]  ;;  %v38_v13 = vld [vmem:[%s423_s0 + $0x48] sm:$0xff]  ;;  %v35_v16 = vld [vmem:[%s423_s0 + $0x30] sm:$0xff]  ;;  %255 = vset.pattern.permute.xlu0 %v284_v19  ;;  %256 = vset.pattern.permute.xlu1 %v284_v19  ;;  %s285_s28 = smov [#allocation3]   ;;  %s218_s9 = sshll.u32 %s430_s7, 4  ;;  %s219_s9 = int_to_ptr.hbm [resolvable:$true] %s218_s9 }
   0x7   :  { %v117_v7 = vsel %vm91_vm0, %v51_v6, 0  ;;  %v49_v14 = vpack.c.bf16 %v38_v13, %v37_v12  ;;  %v36_v17 = vld [vmem:[%s423_s0 + $0x38] sm:$0xff]  ;;  %257 = vset.pattern.permute.xlu2 %v284_v19  ;;  %v33_v21 = vld [vmem:[%s423_s0 + $0x20] sm:$0xff]  ;;  %v34_v22 = vld [vmem:[%s423_s0 + $0x28] sm:$0xff]  ;;  %s216_s29 = sshll.u32 %s285_s28, 4  ;;  %s217_s29 = int_to_ptr.vmem [resolvable:$true] %s216_s29 }
   0x8   :  { %v114_v11 = vsel %vm91_vm0, %v50_v10, 0  ;;  %v48_v18 = vpack.c.bf16 %v36_v17, %v35_v16  ;;  %v59_v23 = vld [vmem:[%s425_s2 + $0x10] sm:$0xff]  ;;  %v57_v24 = vld [vmem:[%s425_s2] sm:$0xff]  ;;  %v47_v25 = vpack.c.bf16 %v34_v22, %v33_v21  ;;  %v32_v28 = vld [vmem:[%s423_s0 + $0x18] sm:$0xff]  ;;  %v208_v16 = vstv %s429_s6 }
   0x9   :  { %v111_v15 = vsel %vm91_vm0, %v49_v14, 0  ;;  %73 = vperm.xlu0 %255, %v59_v23   ;;  %63 = vperm.xlu1 %256, %v57_v24   ;;  %v31_v27 = vld [vmem:[%s423_s0 + $0x10] sm:$0xff]  ;;  %v60_v29 = vld [vmem:[%s425_s2 + $0x18] sm:$0xff]  ;;  %v58_v30 = vld [vmem:[%s425_s2 + $0x8] sm:$0xff] }
   0xa   :  { %v108_v20 = vsel %vm91_vm0, %v48_v18, 0  ;;  %v105_v26 = vsel %vm91_vm0, %v47_v25, 0  ;;  %v46_v31 = vpack.c.bf16 %v32_v28, %v31_v27  ;;  %v29_v33 = vld [vmem:[%s423_s0] sm:$0xff]  ;;  %v30_v34 = vld [vmem:[%s423_s0 + $0x8] sm:$0xff] }
   0xb   :  { %v186_v35 = vld [vmem:[%s428_s5] sm:$0xff]  ;;  %v187_v36 = vld [vmem:[%s428_s5 + $0x8] sm:$0xff]  ;;  %v45_v37 = vpack.c.bf16 %v30_v34, %v29_v33 }
   0xc   :  { %v102_v32 = vsel %vm91_vm0, %v46_v31, 0  ;;  %v243_v39 = vld [vmem:[%s424_s1 + $0x8] sm:$0xff]  ;;  %v242_v40 = vld [vmem:[%s424_s1] sm:$0xff] }
   0xd   :  { %246 = vmatpush.bf16.xpose.msra.mxu2 %v117_v7  ;;  %123 = vmatpush.bf16.xpose.msra.mxu0 %v117_v7  ;;  %v99_v38 = vsel %vm91_vm0, %v45_v37, 0  ;;  %v149_v41 = vld [vmem:[%s427_s4] sm:$0xff]  ;;  %v150_v43 = vld [vmem:[%s427_s4 + $0x8] sm:$0xff] }
   0xe   :  { %153 = vperm.xlu2 %257, %v149_v41   ;;  %v244_v61 = vld [vmem:[%s426_s3] sm:$0xff] }
  0x11   :  { %78 = vperm.xlu0 %255, %v60_v29   ;;  %68 = vperm.xlu1 %256, %v58_v30  }
  0x15   :  { %247 = vmatpush.bf16.xpose.msra.mxu2 %v114_v11  ;;  %124 = vmatpush.bf16.xpose.msra.mxu0 %v114_v11 }
  0x16   :  { %158 = vperm.xlu2 %257, %v150_v43  }
  0x19   :  { %190 = vperm.xlu0 %255, %v186_v35   ;;  %195 = vperm.xlu1 %256, %v187_v36  }
  0x1d   :  { %248 = vmatpush.bf16.xpose.msra.mxu2 %v111_v15  ;;  %125 = vmatpush.bf16.xpose.msra.mxu0 %v111_v15 }
  0x25   :  { %249 = vmatpush.bf16.xpose.msra.mxu2 %v108_v20  ;;  %126 = vmatpush.bf16.xpose.msra.mxu0 %v108_v20 }
  0x2d   :  { %250 = vmatpush.bf16.xpose.msra.mxu2 %v105_v26  ;;  %127 = vmatpush.bf16.xpose.msra.mxu0 %v105_v26 }
  0x35   :  { %251 = vmatpush.bf16.xpose.msra.mxu2 %v102_v32  ;;  %128 = vmatpush.bf16.xpose.msra.mxu0 %v102_v32 }
  0x3d   :  { %252 = vmatpush.bf16.xpose.msra.mxu2 %v99_v38  ;;  %129 = vmatpush.bf16.xpose.msra.mxu0 %v99_v38 }
  0x44   :  { %236 = vmatmul.msk.bf16.vlgmr.msra.gmra.mxu2 %vm91_vm0, %v243_v39  ;;  %235 = vmatmul.msk.bf16.vlgmr.msra.gmra.mxu0 %vm91_vm0, %v242_v40 }
  0x68   :  { %v154_v62 = vpop.permute.xlu2 %153 }
  0x70   :  { %v159_v1 = vpop.permute.xlu2 %158 }
  0x7b   :  { %v74_v44 = vpop.permute.xlu0 %73  ;;  %v64_v45 = vpop.permute.xlu1 %63 }
  0x83   :  { %v79_v48 = vpop.permute.xlu0 %78  ;;  %v69_v50 = vpop.permute.xlu1 %68 }
  0x8b   :  { %v191_v6 = vpop.permute.xlu0 %190  ;;  %v196_v7 = vpop.permute.xlu1 %195 }
  0xc1   :  { %v131_v42 = vpop.f32.mrf.mxu0 }
  0xc2   :  { %v132_v52 = vadd.f32 %v131_v42, %v64_v45 }
  0xc4   :  { %v141_v57 = vmax.f32 %v132_v52, 0.0 }
  0xc7   :  { %v136_v46 = vpop.f32.mrf.mxu2 }
  0xc8   :  { %v137_v49 = vadd.f32 %v136_v46, %v74_v44 }
  0xc9   :  { %v133_v47 = vpop.f32.mrf.mxu0 }
  0xca   :  { %v134_v53 = vadd.f32 %v133_v47, %v69_v50  ;;  %v143_v55 = vmax.f32 %v137_v49, 0.0 }
  0xcc   :  { %v142_v58 = vmax.f32 %v134_v53, 0.0 }
  0xce   :  { %v147_v60 = vpack.c.bf16 %v142_v58, %v141_v57 }
  0xcf   :  { %v138_v51 = vpop.f32.mrf.mxu2 }
  0xd0   :  { %v139_v54 = vadd.f32 %v138_v51, %v79_v48 }
  0xd2   :  { %v144_v56 = vmax.f32 %v139_v54, 0.0 }
  0xd4   :  { %v148_v59 = vpack.c.bf16 %v144_v56, %v143_v55 }
  0xd6   :  { %176 = vmatpush.bf16.msra.mxu1 %v148_v59 }
  0xda   :  { %177 = vmatpush.bf16.msra.mxu1 %v147_v60 }
  0xdd   :  { %241 = vmatmul.msk.bf16.vlgmr.msra.gmra.mxu1 %vm166_vm1, %v244_v61 }
 0x15a   :  { %v179_v63 = vpop.f32.mrf.mxu1 }
 0x15b   :  { %v180_v0 = vadd.f32 %v179_v63, %v154_v62 }
 0x15d   :  { %v184_v3 = vmax.f32 %v180_v0, 0.0 }
 0x15f   :  { %v198_v8 = vmul.f32 %v191_v6, %v184_v3 }
 0x162   :  { %v181_v2 = vpop.f32.mrf.mxu1 }
 0x163   :  { %v182_v4 = vadd.f32 %v181_v2, %v159_v1 }
 0x165   :  { %v185_v5 = vmax.f32 %v182_v4, 0.0 }
 0x167   :  { %v199_v9 = vmul.f32 %v196_v7, %v185_v5 }
 0x169   :  { %v200_v10 = vadd.f32 %v199_v9, %v198_v8 }
 0x16b   :  { %v201_v11 = vrot.slane %v200_v10, 4 }
 0x16d   :  { %v202_v12 = vadd.f32 %v201_v11, %v200_v10 }
 0x16f   :  { %v203_v13 = vrot.slane %v202_v12, 2 }
 0x171   :  { %v204_v14 = vadd.f32 %v203_v13, %v202_v12 }
 0x173   :  { %v205_v15 = vrot.slane %v204_v14, 1 }
 0x175   :  { %v206_v17 = vadd.f32 %v205_v15, %v204_v14 }
 0x177   :  { %v209_v18 = vadd.f32 %v208_v16, %v206_v17 }
 0x179   :  { %210 = vst [vmem:[#allocation3] sm:$0x1] %v209_v18 }
 0x17a   :  { %221 = dma.vmem_to_hbm [thread:$0]  %s217_s29, 16, %s219_s9, [#allocation4]  }
 0x17b   :  { %282 = dma.done.wait [#allocation4], 16  }
 0x17c   :  { %283 = vsyncadd [#allocation4], 4294967280 }
 0x17d   :  { %226 = vsyncpa [#allocation4], 1 }

</bundles_post_ra>
